<compile_context>
chip_gen: v7x
topology: tpu7x:2x2x1
jax: 0.10.0
libtpu: 0.0.40
codegen_flags: <defaults>
</compile_context>

<pallas_src>
import functools
import math

import jax
import jax.numpy as jnp
from jax import lax
from jax.experimental import pallas as pl
from jax.experimental.pallas import tpu as pltpu

N_BITS = 8
N_LEVELS = 2 ** N_BITS
_PCTS = (0.999, 0.9999, 0.99999)

_TARGET_BLOCK_BYTES = 4 * 1024 * 1024   # ~4 MiB input tiles: >=85% HBM roofline;
                                        # 2(in)+2(out) buffers <= 16 MiB -> fits
                                        # v5e/v6e (128 MiB) and v7x (64 MiB) VMEM.
_VMEM_LIMIT = 32 * 1024 * 1024          # explicit scoped limit, safe on all gens.


def _pick_lanes(n):
    """Widest lane count (multiple of 128) dividing n, so the (rows, lanes)
    slab is a zero-copy reshape; otherwise 512 lanes plus a tiny pad."""
    for lanes in (1024, 512, 256, 128):
        if n % lanes == 0:
            return lanes
    return 512


def _candidate_params(x_flat):
    """(delta, zero_point, 1/delta, clamp_lo, clamp_hi) for the 3 percentile clips.

    torch.quantile (linear interpolation) evaluated from the distribution tails
    only: two small lax.top_k calls replace the full sort.
    """
    # TODO(synk): order-statistic selection has no clean Pallas TPU primitive;
    # the tail top_k + interpolation stays in plain JAX glue.
    n = x_flat.shape[0]
    xf = x_flat.astype(jnp.float32)
    k_hi = max(1, min(n, n - math.floor(_PCTS[0] * (n - 1))))
    k_lo = max(1, min(n, math.ceil((1.0 - _PCTS[0]) * (n - 1)) + 1))
    top = lax.top_k(xf, k_hi)[0]          # descending: top[r] == sorted[n - 1 - r]
    bot = -lax.top_k(-xf, k_lo)[0]        # ascending : bot[r] == sorted[r]

    def interp(vals, i0, i1, frac):
        v0, v1 = vals[i0], vals[i1]
        return v0 + jnp.float32(frac) * (v1 - v0)

    new_max, new_min = [], []
    for p in _PCTS:
        pos = p * (n - 1)                                  # upper-tail order stat
        j = math.floor(pos)
        new_max.append(interp(top,
                              min(max(n - 1 - j, 0), k_hi - 1),
                              min(max(n - 2 - j, 0), k_hi - 1),
                              pos - j))
        pos = (1.0 - p) * (n - 1)                          # lower-tail order stat
        j = math.floor(pos)
        new_min.append(interp(bot,
                              min(j, k_lo - 1),
                              min(j + 1, k_lo - 1),
                              pos - j))
    new_max = jnp.stack(new_max)
    new_min = jnp.stack(new_min)

    deltas = (new_max - new_min) / jnp.float32(N_LEVELS - 1)
    zps = jnp.round(-new_min / deltas)
    inv_deltas = 1.0 / deltas             # scalar reciprocals; kernels multiply
    los = -zps                            # clip(round(x/d) + zp, 0, 255) - zp
    his = jnp.float32(N_LEVELS - 1) - zps  #   == clip(round(x/d), -zp, 255 - zp)
    return deltas, zps, inv_deltas, los, his


def _score_kernel(n_ref, invd_ref, lo_ref, hi_ref, x_ref, psum_ref,
                  *, block_rows, lanes, needs_mask):
    """Per-tile, per-candidate partial sums of squared quantization error.

    Error is computed in the scaled domain (x/delta - q); the wrapper applies
    delta^2.  n/invd/lo/hi live in SMEM; x_ref is a (block_rows, lanes) VMEM
    tile; psum_ref is this step's private (1, 3, lanes) output block, so there
    is no cross-step accumulator and the grid axis is fully parallel
    (megacore-shardable on v7x).
    """
    x = x_ref[...].astype(jnp.float32)

    def accumulate(invalid_mask):
        parts = []
        for c in range(len(_PCTS)):
            t = x * invd_ref[c]                                  # x / delta_c
            q = jnp.clip(jnp.round(t), lo_ref[c], hi_ref[c])     # zp folded in bounds
            e2 = (t - q) * (t - q)
            if invalid_mask is not None:
                e2 = jnp.where(invalid_mask, 0.0, e2)
            parts.append(jnp.sum(e2, axis=0, keepdims=True))     # (1, lanes)
        psum_ref[...] = jnp.concatenate(parts, axis=0)[None]     # (1, 3, lanes)

    if not needs_mask:
        accumulate(None)
    else:
        i = pl.program_id(0)
        last = pl.num_programs(0) - 1

        @pl.when(i != last)
        def _():
            accumulate(None)          # hot path: no per-element mask ops

        @pl.when(i == last)
        def _():
            # Mask only the padded / out-of-bounds tail of the final tile.
            row = lax.broadcasted_iota(jnp.int32, (block_rows, lanes), 0)
            lane = lax.broadcasted_iota(jnp.int32, (block_rows, lanes), 1)
            flat_idx = i * (block_rows * lanes) + row * lanes + lane
            accumulate(flat_idx >= n_ref[0])


def _quant_kernel(invd_ref, lo_ref, hi_ref, d_ref, x_ref, o_ref):
    """Quantize / dequantize one tile with the winning (delta, zero_point)."""
    x = x_ref[...].astype(jnp.float32)
    q = jnp.clip(jnp.round(x * invd_ref[0]), lo_ref[0], hi_ref[0])
    o_ref[...] = (q * d_ref[0]).astype(o_ref.dtype)


@jax.jit
def uniform_quantizer_forward(x):
    """UniformQuantizer(n_bits=8, channel_wise=False).forward on a fresh module."""
    orig_shape, orig_dtype = x.shape, x.dtype
    flat = x.reshape(-1)
    n = flat.shape[0]

    deltas, _, inv_deltas, los, his = _candidate_params(flat)

    # ---- lane-dense 2-D slab; zero-copy reshape whenever lanes | n ----
    lanes = _pick_lanes(n)
    did_pad = (n % lanes) != 0
    if did_pad:
        flat = jnp.pad(flat, (0, lanes - n % lanes))   # tiny pad (< lanes elems)
    rows = flat.shape[0] // lanes
    x2d = flat.reshape(rows, lanes)

    itemsize = jnp.dtype(orig_dtype).itemsize
    cap = max(32, (_TARGET_BLOCK_BYTES // (lanes * itemsize)) // 32 * 32)
    if rows <= cap:
        block_rows, grid = rows, 1                     # single full-extent block
    else:
        block_rows, grid = cap, pl.cdiv(rows, cap)     # boundary block masked in-kernel
    needs_mask = (grid * block_rows * lanes) != n

    smem = pl.BlockSpec(memory_space=pltpu.MemorySpace.SMEM)
    tile = pl.BlockSpec((block_rows, lanes), lambda i: (i, 0))
    cparams = pltpu.CompilerParams(dimension_semantics=("parallel",),
                                   vmem_limit_bytes=_VMEM_LIMIT)

    # ---- kernel A: streamed scoring, per-tile partial sums ----
    psum = pl.pallas_call(
        functools.partial(_score_kernel, block_rows=block_rows, lanes=lanes,
                          needs_mask=needs_mask),
        out_shape=jax.ShapeDtypeStruct((grid, len(_PCTS), lanes), jnp.float32),
        grid=(grid,),
        in_specs=[smem, smem, smem, smem, tile],
        out_specs=pl.BlockSpec((1, len(_PCTS), lanes), lambda i: (i, 0, 0)),
        compiler_params=cparams,
    )(jnp.full((1,), n, jnp.int32), inv_deltas, los, his, x2d)

    # Scaled-error sums * delta^2 == torch's sum of squared errors (up to fp
    # association); argmin over sums == argmin over means, and jnp.argmin's
    # first-minimum rule matches torch's strict '<' update.
    scores = jnp.sum(psum, axis=(0, 2)) * (deltas * deltas)
    best = jnp.argmin(scores)

    best_args = (jnp.reshape(inv_deltas[best], (1,)),
                 jnp.reshape(los[best], (1,)),
                 jnp.reshape(his[best], (1,)),
                 jnp.reshape(deltas[best], (1,)))

    # ---- kernel B: quantize / dequantize with the winning parameters ----
    out2d = pl.pallas_call(
        _quant_kernel,
        out_shape=jax.ShapeDtypeStruct((rows, lanes), orig_dtype),
        grid=(grid,),
        in_specs=[smem, smem, smem, smem, tile],
        out_specs=tile,
        # When a fresh padded buffer was created, this kernel is its last
        # consumer -> write the result in place (smaller peak HBM footprint).
        input_output_aliases=({4: 0} if did_pad else {}),
        compiler_params=cparams,
    )(*best_args, x2d)

    out = out2d.reshape(-1)
    if did_pad:
        out = out[:n]
    return out.reshape(orig_shape)


def _reference_forward(x):
    """Pure-JAX mirror of the PyTorch module (sanity check).

    Shares the top_k-based torch.quantile replacement with the kernel path and,
    like the kernels, multiplies by 1/delta instead of dividing by delta
    (<= 1 ulp difference on the pre-round value vs torch; within the 1e-5 tol).
    """
    xf = x.astype(jnp.float32)
    flat = xf.reshape(-1)
    deltas, zps, inv_deltas, _, _ = _candidate_params(flat)
    scores = []
    for c in range(len(_PCTS)):
        q = jnp.clip(jnp.round(flat * inv_deltas[c]) + zps[c], 0.0, N_LEVELS - 1)
        xfq = (q - zps[c]) * deltas[c]
        scores.append(jnp.mean((flat - xfq) ** 2))
    best = jnp.argmin(jnp.stack(scores))
    d, z, iv = deltas[best], zps[best], inv_deltas[best]
    q = jnp.clip(jnp.round(xf * iv) + z, 0.0, N_LEVELS - 1)
    return ((q - z) * d).astype(x.dtype)


if __name__ == "__main__":
    key = jax.random.PRNGKey(0)
    # NCHW-style activation tensor, matching the torch module's 4-D usage.
    x = jax.random.normal(key, (2, 4, 16, 16), dtype=jnp.float32)

    y = uniform_quantizer_forward(x)
    jax.block_until_ready(y)

    # Kernel path vs pure-JAX reference.
    y_ref = _reference_forward(x)
    assert y.shape == x.shape and y.dtype == x.dtype
    assert jnp.allclose(y, y_ref, atol=1e-5, rtol=1e-5)

    # Tail-only top_k selection vs full-sort quantile (loose tol covers the
    # f32 index rounding inside jnp.quantile).
    flat = x.reshape(-1).astype(jnp.float32)
    pcts = jnp.asarray(_PCTS, jnp.float32)
    qs = jnp.quantile(flat, jnp.concatenate([pcts, 1.0 - pcts]))
    d_sort = (qs[:3] - qs[3:]) / (N_LEVELS - 1)
    assert jnp.allclose(_candidate_params(flat)[0], d_sort, rtol=1e-3, atol=1e-4)

    print("KERNEL_OK")
</pallas_src>

<mosaic_0001>
module attributes {stable_mosaic.version = 11 : i64} {
  func.func @_score_kernel(%arg0: i32, %arg1: memref<1xi32, #tpu.memory_space<smem>>, %arg2: memref<3xf32, #tpu.memory_space<smem>>, %arg3: memref<3xf32, #tpu.memory_space<smem>>, %arg4: memref<3xf32, #tpu.memory_space<smem>>, %arg5: memref<2x1024xf32, #tpu.memory_space<vmem>>, %arg6: memref<1x3x1024xf32, #tpu.memory_space<vmem>>) attributes {dimension_semantics = [#tpu.dimension_semantics<parallel>], iteration_bounds = array<i64: 1>, scalar_prefetch = 0 : i64, scratch_operands = 0 : i64, tpu.core_type = #tpu.core_type<tc>, window_params = [{transform_indices = @transform_0, window_bounds = array<i64: 1>}, {transform_indices = @transform_1, window_bounds = array<i64: 3>}, {transform_indices = @transform_2, window_bounds = array<i64: 3>}, {transform_indices = @transform_3, window_bounds = array<i64: 3>}, {transform_indices = @transform_4, window_bounds = array<i64: 2, 1024>}, {transform_indices = @transform_5, window_bounds = array<i64: 1, 3, 1024>}]} {
    %c0 = arith.constant 0 : index
    %c0_0 = arith.constant 0 : index
    %0 = vector.load %arg5[%c0, %c0_0] : memref<2x1024xf32, #tpu.memory_space<vmem>>, vector<2x1024xf32>
    %c0_1 = arith.constant 0 : index
    %1 = memref.load %arg2[%c0_1] : memref<3xf32, #tpu.memory_space<smem>>
    %2 = vector.broadcast %1 : f32 to vector<2x1024xf32>
    %3 = arith.mulf %0, %2 : vector<2x1024xf32>
    %4 = math.roundeven %3 : vector<2x1024xf32>
    %c0_2 = arith.constant 0 : index
    %5 = memref.load %arg3[%c0_2] : memref<3xf32, #tpu.memory_space<smem>>
    %c0_3 = arith.constant 0 : index
    %6 = memref.load %arg4[%c0_3] : memref<3xf32, #tpu.memory_space<smem>>
    %7 = vector.broadcast %5 : f32 to vector<2x1024xf32>
    %8 = arith.maximumf %7, %4 : vector<2x1024xf32>
    %9 = vector.broadcast %6 : f32 to vector<2x1024xf32>
    %10 = arith.minimumf %9, %8 : vector<2x1024xf32>
    %11 = arith.subf %3, %10 : vector<2x1024xf32>
    %12 = arith.subf %3, %10 : vector<2x1024xf32>
    %13 = arith.mulf %11, %12 : vector<2x1024xf32>
    %cst = arith.constant dense<0.000000e+00> : vector<1024xf32>
    %14 = vector.multi_reduction <add>, %13, %cst [0] : vector<2x1024xf32> to vector<1024xf32>
    %15 = vector.shape_cast %14 : vector<1024xf32> to vector<1x1024xf32>
    %c1 = arith.constant 1 : index
    %16 = memref.load %arg2[%c1] : memref<3xf32, #tpu.memory_space<smem>>
    %17 = vector.broadcast %16 : f32 to vector<2x1024xf32>
    %18 = arith.mulf %0, %17 : vector<2x1024xf32>
    %19 = math.roundeven %18 : vector<2x1024xf32>
    %c1_4 = arith.constant 1 : index
    %20 = memref.load %arg3[%c1_4] : memref<3xf32, #tpu.memory_space<smem>>
    %c1_5 = arith.constant 1 : index
    %21 = memref.load %arg4[%c1_5] : memref<3xf32, #tpu.memory_space<smem>>
    %22 = vector.broadcast %20 : f32 to vector<2x1024xf32>
    %23 = arith.maximumf %22, %19 : vector<2x1024xf32>
    %24 = vector.broadcast %21 : f32 to vector<2x1024xf32>
    %25 = arith.minimumf %24, %23 : vector<2x1024xf32>
    %26 = arith.subf %18, %25 : vector<2x1024xf32>
    %27 = arith.subf %18, %25 : vector<2x1024xf32>
    %28 = arith.mulf %26, %27 : vector<2x1024xf32>
    %cst_6 = arith.constant dense<0.000000e+00> : vector<1024xf32>
    %29 = vector.multi_reduction <add>, %28, %cst_6 [0] : vector<2x1024xf32> to vector<1024xf32>
    %30 = vector.shape_cast %29 : vector<1024xf32> to vector<1x1024xf32>
    %c2 = arith.constant 2 : index
    %31 = memref.load %arg2[%c2] : memref<3xf32, #tpu.memory_space<smem>>
    %32 = vector.broadcast %31 : f32 to vector<2x1024xf32>
    %33 = arith.mulf %0, %32 : vector<2x1024xf32>
    %34 = math.roundeven %33 : vector<2x1024xf32>
    %c2_7 = arith.constant 2 : index
    %35 = memref.load %arg3[%c2_7] : memref<3xf32, #tpu.memory_space<smem>>
    %c2_8 = arith.constant 2 : index
    %36 = memref.load %arg4[%c2_8] : memref<3xf32, #tpu.memory_space<smem>>
    %37 = vector.broadcast %35 : f32 to vector<2x1024xf32>
    %38 = arith.maximumf %37, %34 : vector<2x1024xf32>
    %39 = vector.broadcast %36 : f32 to vector<2x1024xf32>
    %40 = arith.minimumf %39, %38 : vector<2x1024xf32>
    %41 = arith.subf %33, %40 : vector<2x1024xf32>
    %42 = arith.subf %33, %40 : vector<2x1024xf32>
    %43 = arith.mulf %41, %42 : vector<2x1024xf32>
    %cst_9 = arith.constant dense<0.000000e+00> : vector<1024xf32>
    %44 = vector.multi_reduction <add>, %43, %cst_9 [0] : vector<2x1024xf32> to vector<1024xf32>
    %45 = vector.shape_cast %44 : vector<1024xf32> to vector<1x1024xf32>
    %46 = tpu.concatenate %15, %30, %45 in 0 : vector<1x1024xf32>, vector<1x1024xf32>, vector<1x1024xf32> -> vector<3x1024xf32>
    %47 = vector.shape_cast %46 : vector<3x1024xf32> to vector<1x3x1024xf32>
    %c0_10 = arith.constant 0 : index
    %c0_11 = arith.constant 0 : index
    %c0_12 = arith.constant 0 : index
    %48 = vector.load %arg6[%c0_10, %c0_11, %c0_12] : memref<1x3x1024xf32, #tpu.memory_space<vmem>>, vector<1x3x1024xf32>
    tpu.vector_store %arg6[%c0_10, %c0_11, %c0_12], %47 {strides = array<i32>} : memref<1x3x1024xf32, #tpu.memory_space<vmem>>, vector<1x3x1024xf32>,
    return
  }
  func.func @transform_0(%arg0: i32) -> i32 {
    %c0_i32 = arith.constant 0 : i32
    %c0_i32_0 = arith.constant 0 : i32
    return %c0_i32 : i32
  }
  func.func @transform_1(%arg0: i32) -> i32 {
    %c0_i32 = arith.constant 0 : i32
    %c0_i32_0 = arith.constant 0 : i32
    return %c0_i32 : i32
  }
  func.func @transform_2(%arg0: i32) -> i32 {
    %c0_i32 = arith.constant 0 : i32
    %c0_i32_0 = arith.constant 0 : i32
    return %c0_i32 : i32
  }
  func.func @transform_3(%arg0: i32) -> i32 {
    %c0_i32 = arith.constant 0 : i32
    %c0_i32_0 = arith.constant 0 : i32
    return %c0_i32 : i32
  }
  func.func @transform_4(%arg0: i32) -> (i32, i32) {
    %c0_i32 = arith.constant 0 : i32
    %c0_i32_0 = arith.constant 0 : i32
    return %arg0, %c0_i32 : i32, i32
  }
  func.func @transform_5(%arg0: i32) -> (i32, i32, i32) {
    %c0_i32 = arith.constant 0 : i32
    %c0_i32_0 = arith.constant 0 : i32
    %c0_i32_1 = arith.constant 0 : i32
    return %arg0, %c0_i32, %c0_i32_0 : i32, i32, i32
  }
}

module attributes {stable_mosaic.version = 11 : i64} {
  func.func @_quant_kernel(%arg0: i32, %arg1: memref<1xf32, #tpu.memory_space<smem>>, %arg2: memref<1xf32, #tpu.memory_space<smem>>, %arg3: memref<1xf32, #tpu.memory_space<smem>>, %arg4: memref<1xf32, #tpu.memory_space<smem>>, %arg5: memref<2x1024xf32, #tpu.memory_space<vmem>>, %arg6: memref<2x1024xf32, #tpu.memory_space<vmem>>) attributes {dimension_semantics = [#tpu.dimension_semantics<parallel>], iteration_bounds = array<i64: 1>, scalar_prefetch = 0 : i64, scratch_operands = 0 : i64, tpu.core_type = #tpu.core_type<tc>, window_params = [{transform_indices = @transform_0, window_bounds = array<i64: 1>}, {transform_indices = @transform_1, window_bounds = array<i64: 1>}, {transform_indices = @transform_2, window_bounds = array<i64: 1>}, {transform_indices = @transform_3, window_bounds = array<i64: 1>}, {transform_indices = @transform_4, window_bounds = array<i64: 2, 1024>}, {transform_indices = @transform_5, window_bounds = array<i64: 2, 1024>}]} {
    %c0 = arith.constant 0 : index
    %c0_0 = arith.constant 0 : index
    %0 = vector.load %arg5[%c0, %c0_0] : memref<2x1024xf32, #tpu.memory_space<vmem>>, vector<2x1024xf32>
    %c0_1 = arith.constant 0 : index
    %1 = memref.load %arg1[%c0_1] : memref<1xf32, #tpu.memory_space<smem>>
    %2 = vector.broadcast %1 : f32 to vector<2x1024xf32>
    %3 = arith.mulf %0, %2 : vector<2x1024xf32>
    %4 = math.roundeven %3 : vector<2x1024xf32>
    %c0_2 = arith.constant 0 : index
    %5 = memref.load %arg2[%c0_2] : memref<1xf32, #tpu.memory_space<smem>>
    %c0_3 = arith.constant 0 : index
    %6 = memref.load %arg3[%c0_3] : memref<1xf32, #tpu.memory_space<smem>>
    %7 = vector.broadcast %5 : f32 to vector<2x1024xf32>
    %8 = arith.maximumf %7, %4 : vector<2x1024xf32>
    %9 = vector.broadcast %6 : f32 to vector<2x1024xf32>
    %10 = arith.minimumf %9, %8 : vector<2x1024xf32>
    %c0_4 = arith.constant 0 : index
    %11 = memref.load %arg4[%c0_4] : memref<1xf32, #tpu.memory_space<smem>>
    %12 = vector.broadcast %11 : f32 to vector<2x1024xf32>
    %13 = arith.mulf %10, %12 : vector<2x1024xf32>
    %c0_5 = arith.constant 0 : index
    %c0_6 = arith.constant 0 : index
    %14 = vector.load %arg6[%c0_5, %c0_6] : memref<2x1024xf32, #tpu.memory_space<vmem>>, vector<2x1024xf32>
    tpu.vector_store %arg6[%c0_5, %c0_6], %13 {strides = array<i32>} : memref<2x1024xf32, #tpu.memory_space<vmem>>, vector<2x1024xf32>,
    return
  }
  func.func @transform_0(%arg0: i32) -> i32 {
    %c0_i32 = arith.constant 0 : i32
    %c0_i32_0 = arith.constant 0 : i32
    return %c0_i32 : i32
  }
  func.func @transform_1(%arg0: i32) -> i32 {
    %c0_i32 = arith.constant 0 : i32
    %c0_i32_0 = arith.constant 0 : i32
    return %c0_i32 : i32
  }
  func.func @transform_2(%arg0: i32) -> i32 {
    %c0_i32 = arith.constant 0 : i32
    %c0_i32_0 = arith.constant 0 : i32
    return %c0_i32 : i32
  }
  func.func @transform_3(%arg0: i32) -> i32 {
    %c0_i32 = arith.constant 0 : i32
    %c0_i32_0 = arith.constant 0 : i32
    return %c0_i32 : i32
  }
  func.func @transform_4(%arg0: i32) -> (i32, i32) {
    %c0_i32 = arith.constant 0 : i32
    %c0_i32_0 = arith.constant 0 : i32
    return %arg0, %c0_i32 : i32, i32
  }
  func.func @transform_5(%arg0: i32) -> (i32, i32) {
    %c0_i32 = arith.constant 0 : i32
    %c0_i32_0 = arith.constant 0 : i32
    return %arg0, %c0_i32 : i32, i32
  }
}

</mosaic_0001>

<bundles_post_ra>
// kernel: neg.4
= control target key start
LH: loop header
LB: loop body
LE: loop exit
PB: predicated region body
PF: predicated region fallthrough
CT: control target
= control target key end

     0   :  { %s40_s0 = inlined_call_operand.vmem [shape: f32[2048], index: 0, kind: input, shape index: {}]   ;;  %s41_s1 = inlined_call_operand.vmem [shape: f32[2048], index: 1, kind: output, shape index: {}]  }
   0x1   :  { %v2_v0 = vld [vmem:[%s40_s0] sm:$0xff]  ;;  %v16_v1 = vld [vmem:[%s40_s0 + $0x8] sm:$0xff] }
   0x2   :  { %v5_v2 = vxor.u32 2147483648, %v2_v0  ;;  %v12_v3 = vxor.u32 2147483648, %v16_v1 }
   0x4   :  { %7 = vst [vmem:[%s41_s1] sm:$0xff] %v5_v2  ;;  %17 = vst [vmem:[%s41_s1 + $0x8] sm:$0xff] %v12_v3 }

// kernel: neg.7
= control target key start
LH: loop header
LB: loop body
LE: loop exit
PB: predicated region body
PF: predicated region fallthrough
CT: control target
= control target key end

     0   :  { %s24_s0 = inlined_call_operand.vmem [shape: f32[3], index: 0, kind: input, shape index: {}]   ;;  %s25_s1 = inlined_call_operand.vmem [shape: f32[3], index: 1, kind: output, shape index: {}]  }
   0x1   :  { %v2_v0 = vld [vmem:[%s24_s0] sm:$0x1] }
   0x2   :  { %v5_v1 = vxor.u32 2147483648, %v2_v0 }
   0x4   :  { %7 = vst [vmem:[%s25_s1] sm:$0x1] %v5_v1 }

// kernel: uniform_quantizer_forward.2
= control target key start
LH: loop header
LB: loop body
LE: loop exit
PB: predicated region body
PF: predicated region fallthrough
CT: control target
= control target key end

     0   :  { %11 = vsyncpa [#allocation4], 0  ;;  %s714_s0 = inlined_call_operand.<no memory space> [shape: s32[1], index: 0, kind: input, shape index: {}]   ;;  %s715_s1 = inlined_call_operand.vmem [shape: f32[3], index: 1, kind: input, shape index: {}]   ;;  %s716_s2 = inlined_call_operand.vmem [shape: f32[3], index: 2, kind: input, shape index: {}]   ;;  %s717_s3 = inlined_call_operand.vmem [shape: f32[3], index: 3, kind: input, shape index: {}]   ;;  %s718_s4 = inlined_call_operand.vmem [shape: f32[2,1024], index: 4, kind: input, shape index: {}]   ;;  %s719_s5 = inlined_call_operand.vmem [shape: f32[1,3,1024], index: 5, kind: output, shape index: {}]  }
   0x1   :  { %12 = vsyncpa [#allocation6], 0  ;;  %s31_s0 = sshll.u32 %s716_s2, 4  ;;  %s21_s22 = sshll.u32 %s715_s1, 4  ;;  %s32_s0 = int_to_ptr.vmem [resolvable:$true] %s31_s0  ;;  %s22_s22 = int_to_ptr.vmem [resolvable:$true] %s21_s22 }
   0x2   :  { %s473_s23 = scalar_lea.vmem %s32_s0, 16  ;;  %p478_p1 = scmp.lt.s32.totalorder %s32_s0, %s32_s0 }
   0x3   :  { %p474_p0 = scmp.ne.s32.totalorder %s32_s0, %s473_s23  ;;  %p479_p2 = scmp.lt.s32.totalorder %s473_s23, %s473_s23 }
   0x5   :  { %p480_p3 = por %p479_p2, %p478_p1 }
   0x7   :  { %p481_p4 = pnand %p480_p3, %p474_p0 }
   0x9   :  { %484 = shalt.err (!%p481_p4)
}
   0xa   :  { %s513_s24 = smov [#allocation5]   ;;  %s485_s25 = scalar_lea.vmem %s22_s22, 16 }
   0xb   :  { %34 = dma.vmem_to_smem %s32_s0, 16, %s513_s24, [#allocation6]  }
   0xc   :  { %p486_p5 = scmp.ne.s32.totalorder %s22_s22, %s485_s25  ;;  %p490_p6 = scmp.lt.s32.totalorder %s22_s22, %s22_s22 }
   0xd   :  { %p491_p7 = scmp.lt.s32.totalorder %s485_s25, %s485_s25 }
   0xf   :  { %p492_p8 = por %p491_p7, %p490_p6 }
  0x11   :  { %p493_p9 = pnand %p492_p8, %p486_p5 }
  0x13   :  { %496 = shalt.err (!%p493_p9)
}
  0x14   :  { %s514_s2 = smov [#allocation3]   ;;  %s41_s27 = sshll.u32 %s717_s3, 4  ;;  %s42_s27 = int_to_ptr.vmem [resolvable:$true] %s41_s27 }
  0x15   :  { %24 = dma.vmem_to_smem %s22_s22, 16, %s514_s2, [#allocation4]  }
  0x16   :  { %s497_s28 = scalar_lea.vmem %s42_s27, 16  ;;  %p502_p11 = scmp.lt.s32.totalorder %s42_s27, %s42_s27 }
  0x17   :  { %p498_p10 = scmp.ne.s32.totalorder %s42_s27, %s497_s28  ;;  %p503_p12 = scmp.lt.s32.totalorder %s497_s28, %s497_s28 }
  0x19   :  { %p504_p13 = por %p503_p12, %p502_p11 }
  0x1b   :  { %p505_p0 = pnand %p504_p13, %p498_p10 }
  0x1d   :  { %508 = shalt.err (!%p505_p0)
}
  0x1e   :  { %s515_s29 = smov [#allocation7]  }
  0x1f   :  { %44 = dma.vmem_to_smem %s42_s27, 16, %s515_s29, [#allocation6]  }
  0x20   :  { %509 = dma.done.wait [#allocation4], 16  }
  0x21   :  { %510 = vsyncadd [#allocation4], 4294967280 }
  0x22   :  { %511 = dma.done.wait [#allocation6], 32  }
  0x23   :  { %512 = vsyncadd [#allocation6], 4294967264 }
  0x24   :  { %56 = sfence }
  0x25   :  { %s59_s30 = sld [smem:[#allocation3]]  ;;  %s457_s3 = sld [smem:[#allocation3 + $0x1]]  ;;  %v57_v0 = vld [vmem:[%s718_s4] sm:$0xff]  ;;  %v58_v1 = vld [vmem:[%s718_s4 + $0x8] sm:$0xff]  ;;  %v83_v2 = vlaneseq  ;;  %v516_v4 = vmov 1983009808  }
  0x26   :  { %s65_s6 = sld [smem:[#allocation5]]  ;;  %s558_s8 = sld [smem:[#allocation5 + $0x1]]  ;;  %v81_v5 = vunpack.c.l.s4 %v516_v4  ;;  %vm121_vm0 = vcmask 1041408   ;;  %vm414_vm1 = vcmask 1040384  }
  0x27   :  { %s556_s7 = sld [smem:[#allocation7]]  ;;  %s460_s9 = sld [smem:[#allocation3 + $0x2]]  ;;  %v84_v9 = vshrl.u32 %v83_v2, 7 }
  0x28   :  { %s566_s14 = sld [smem:[#allocation7 + $0x1]]  ;;  %s568_s15 = sld [smem:[#allocation5 + $0x2]]  ;;  %v82_v16 = vunpack.c.0.s8 %v81_v5 }
  0x29   :  { %s570_s16 = sld [smem:[#allocation7 + $0x2]] }
  0x2a   :  { %v576_v31 = vsub.s32 %v82_v16, %v84_v9 }
  0x2b   :  { %v60_v3 = vstv %s59_s30  ;;  %v179_v10 = vstv %s457_s3 }
  0x2c   :  { %v61_v6 = vmul.f32 %v60_v3, %v57_v0  ;;  %v62_v7 = vmul.f32 %v60_v3, %v58_v1  ;;  %v67_v8 = vstv %s65_s6  ;;  %v180_v13 = vmul.f32 %v179_v10, %v57_v0 }
  0x2d   :  { %v181_v14 = vmul.f32 %v179_v10, %v58_v1  ;;  %v70_v15 = vstv %s556_s7  ;;  %v186_v17 = vstv %s558_s8  ;;  %v297_v18 = vstv %s460_s9 }
  0x2e   :  { %v463_v11 = vround.rtne.f32 %v61_v6  ;;  %v464_v12 = vround.rtne.f32 %v62_v7  ;;  %v465_v21 = vround.rtne.f32 %v180_v13  ;;  %v189_v23 = vstv %s566_s14 }
  0x2f   :  { %v466_v22 = vround.rtne.f32 %v181_v14  ;;  %v298_v24 = vmul.f32 %v297_v18, %v57_v0  ;;  %v299_v25 = vmul.f32 %v297_v18, %v58_v1  ;;  %v304_v26 = vstv %s568_s15 }
  0x30   :  { %v68_v19 = vmax.f32 %v67_v8, %v463_v11  ;;  %v69_v20 = vmax.f32 %v67_v8, %v464_v12  ;;  %v187_v29 = vmax.f32 %v186_v17, %v465_v21  ;;  %v307_v34 = vstv %s570_s16 }
  0x31   :  { %v188_v30 = vmax.f32 %v186_v17, %v466_v22  ;;  %v467_v32 = vround.rtne.f32 %v298_v24  ;;  %v468_v33 = vround.rtne.f32 %v299_v25 }
  0x32   :  { %v71_v27 = vmin.f32 %v70_v15, %v68_v19  ;;  %v72_v28 = vmin.f32 %v70_v15, %v69_v20  ;;  %v190_v37 = vmin.f32 %v189_v23, %v187_v29 }
  0x33   :  { %v191_v38 = vmin.f32 %v189_v23, %v188_v30  ;;  %v305_v39 = vmax.f32 %v304_v26, %v467_v32  ;;  %v306_v40 = vmax.f32 %v304_v26, %v468_v33 }
  0x34   :  { %v73_v35 = vsub.f32 %v61_v6, %v71_v27  ;;  %v74_v36 = vsub.f32 %v62_v7, %v72_v28  ;;  %v192_v43 = vsub.f32 %v180_v13, %v190_v37 }
  0x35   :  { %v193_v44 = vsub.f32 %v181_v14, %v191_v38  ;;  %v308_v45 = vmin.f32 %v307_v34, %v305_v39  ;;  %v309_v46 = vmin.f32 %v307_v34, %v306_v40 }
  0x36   :  { %v75_v41 = vmul.f32 %v73_v35, %v73_v35  ;;  %v76_v42 = vmul.f32 %v74_v36, %v74_v36  ;;  %v581_v51 = vmul.f32 %v192_v43, %v192_v43 }
  0x37   :  { %v583_v52 = vmul.f32 %v193_v44, %v193_v44  ;;  %v585_v53 = vsub.f32 %v298_v24, %v308_v45  ;;  %v587_v54 = vsub.f32 %v299_v25, %v309_v46 }
  0x38   :  { %v79_v47 = vcombine.high %v75_v41, %v75_v41  ;;  %v86_v48 = vrot.slane %v75_v41, %v576_v31  ;;  %v96_v49 = vcombine.high %v76_v42, %v76_v42  ;;  %v103_v50 = vrot.slane %v76_v42, %v576_v31 }
  0x39   :  { %v198_v61 = vcombine.high %v581_v51, %v581_v51  ;;  %v597_v62 = vrot.slane %v581_v51, %v576_v31 }
  0x3a   :  { %v93_v55 = vrot.slane %v79_v47, %v576_v31  ;;  %v94_v56 = vcombine.high %v86_v48, %v86_v48  ;;  %v110_v57 = vrot.slane %v96_v49, %v576_v31  ;;  %v111_v58 = vcombine.high %v103_v50, %v103_v50 }
  0x3b   :  { %v122_v59 = vsel %vm121_vm0, %v86_v48, 0.0  ;;  %v150_v60 = vsel %vm121_vm0, %v103_v50, 0.0  ;;  %v212_v51 = vrot.slane %v198_v61, %v576_v31 }
  0x3c   :  { %v95_v63 = vcombine.high %v93_v55, %v93_v55  ;;  %v112_v0 = vcombine.high %v110_v57, %v110_v57  ;;  %v123_v1 = vrot.slane %v122_v59, 4  ;;  %v129_v2 = vsel %vm121_vm0, %v94_v56, 0.0 }
  0x3d   :  { %v130_v3 = vrot.slane %v129_v2, 4  ;;  %v136_v4 = vsel %vm121_vm0, %v93_v55, 0.0  ;;  %v151_v5 = vrot.slane %v150_v60, 4  ;;  %v157_v6 = vsel %vm121_vm0, %v111_v58, 0.0 }
  0x3e   :  { %v124_v7 = vadd.f32 %v123_v1, %v122_v59  ;;  %v137_v8 = vrot.slane %v136_v4, 4  ;;  %v143_v9 = vsel %vm121_vm0, %v95_v63, 0.0  ;;  %v158_v10 = vrot.slane %v157_v6, 4 }
  0x3f   :  { %v131_v11 = vadd.f32 %v130_v3, %v129_v2  ;;  %v144_v12 = vrot.slane %v143_v9, 4  ;;  %v152_v13 = vadd.f32 %v151_v5, %v150_v60  ;;  %v164_v14 = vsel %vm121_vm0, %v110_v57, 0.0 }
  0x40   :  { %v125_v15 = vrot.slane %v124_v7, 2  ;;  %v138_v16 = vadd.f32 %v137_v8, %v136_v4  ;;  %v159_v17 = vadd.f32 %v158_v10, %v157_v6  ;;  %v165_v18 = vrot.slane %v164_v14, 4 }
  0x41   :  { %v132_v19 = vrot.slane %v131_v11, 2  ;;  %v145_v20 = vadd.f32 %v144_v12, %v143_v9  ;;  %v153_v21 = vrot.slane %v152_v13, 2  ;;  %v171_v22 = vsel %vm121_vm0, %v112_v0, 0.0 }
  0x42   :  { %v126_v23 = vadd.f32 %v125_v15, %v124_v7  ;;  %v139_v24 = vrot.slane %v138_v16, 2  ;;  %v160_v25 = vrot.slane %v159_v17, 2  ;;  %v166_v26 = vadd.f32 %v165_v18, %v164_v14 }
  0x43   :  { %v133_v27 = vadd.f32 %v132_v19, %v131_v11  ;;  %v146_v28 = vrot.slane %v145_v20, 2  ;;  %v154_v29 = vadd.f32 %v153_v21, %v152_v13  ;;  %v172_v30 = vrot.slane %v171_v22, 4 }
  0x44   :  { %v127_v32 = vrot.slane %v126_v23, 1  ;;  %v140_v33 = vadd.f32 %v139_v24, %v138_v16  ;;  %v161_v34 = vadd.f32 %v160_v25, %v159_v17  ;;  %v167_v35 = vrot.slane %v166_v26, 2 }
  0x45   :  { %v134_v36 = vrot.slane %v133_v27, 1  ;;  %v147_v37 = vadd.f32 %v146_v28, %v145_v20  ;;  %v155_v38 = vrot.slane %v154_v29, 1  ;;  %v173_v39 = vadd.f32 %v172_v30, %v171_v22 }
  0x46   :  { %v605_v40 = vadd.f32 %v127_v32, %v126_v23  ;;  %v141_v41 = vrot.slane %v140_v33, 1  ;;  %v162_v42 = vrot.slane %v161_v34, 1  ;;  %v168_v43 = vadd.f32 %v167_v35, %v166_v26 }
  0x47   :  { %v607_v44 = vadd.f32 %v134_v36, %v133_v27  ;;  %v148_v45 = vrot.slane %v147_v37, 1  ;;  %v609_v46 = vadd.f32 %v155_v38, %v154_v29  ;;  %v174_v47 = vrot.slane %v173_v39, 2 }
  0x48   :  { %v611_v48 = vadd.f32 %v141_v41, %v140_v33  ;;  %v613_v49 = vadd.f32 %v162_v42, %v161_v34  ;;  %v169_v50 = vrot.slane %v168_v43, 1  ;;  %v213_v57 = vcombine.high %v597_v62, %v597_v62 }
  0x49   :  { %v616_v55 = vadd.f32 %v148_v45, %v147_v37  ;;  %v175_v56 = vadd.f32 %v174_v47, %v173_v39  ;;  %v215_v58 = vcombine.high %v583_v52, %v583_v52  ;;  %v214_v60 = vcombine.high %v212_v51, %v212_v51 }
  0x4a   :  { %v622_v59 = vadd.f32 %v169_v50, %v168_v43  ;;  %v222_v63 = vrot.slane %v583_v52, %v576_v31  ;;  %v240_v0 = vsel %vm121_vm0, %v597_v62, 0.0  ;;  %v247_v3 = vsel %vm121_vm0, %v213_v57, 0.0 }
  0x4b   :  { %v176_v1 = vrot.slane %v175_v56, 1  ;;  %v229_v61 = vrot.slane %v215_v58, %v576_v31  ;;  %v241_v2 = vrot.slane %v240_v0, 4  ;;  %v248_v5 = vrot.slane %v247_v3, 4 }
  0x4c   :  { %v230_v4 = vcombine.high %v222_v63, %v222_v63  ;;  %v254_v6 = vsel %vm121_vm0, %v212_v51, 0.0  ;;  %v261_v7 = vsel %vm121_vm0, %v214_v60, 0.0  ;;  %v268_v62 = vsel %vm121_vm0, %v222_v63, 0.0 }
  0x4d   :  { %v632_v8 = vadd.f32 %v176_v1, %v175_v56  ;;  %v231_v9 = vcombine.high %v229_v61, %v229_v61  ;;  %v242_v10 = vadd.f32 %v241_v2, %v240_v0  ;;  %v255_v52 = vrot.slane %v254_v6, 4 }
  0x4e   :  { %v249_v11 = vadd.f32 %v248_v5, %v247_v3  ;;  %v262_v12 = vrot.slane %v261_v7, 4  ;;  %v275_v13 = vsel %vm121_vm0, %v230_v4, 0.0  ;;  %v269_v16 = vrot.slane %v268_v62, 4 }
  0x4f   :  { %v243_v14 = vrot.slane %v242_v10, 2  ;;  %v256_v15 = vadd.f32 %v255_v52, %v254_v6  ;;  %v276_v17 = vrot.slane %v275_v13, 4  ;;  %v282_v20 = vsel %vm121_vm0, %v229_v61, 0.0 }
  0x50   :  { %v250_v18 = vrot.slane %v249_v11, 2  ;;  %v263_v19 = vadd.f32 %v262_v12, %v261_v7  ;;  %v289_v21 = vsel %vm121_vm0, %v231_v9, 0.0  ;;  %v270_v24 = vadd.f32 %v269_v16, %v268_v62 }
  0x51   :  { %v244_v22 = vadd.f32 %v243_v14, %v242_v10  ;;  %v257_v23 = vrot.slane %v256_v15, 2  ;;  %v277_v25 = vadd.f32 %v276_v17, %v275_v13  ;;  %v283_v28 = vrot.slane %v282_v20, 4 }
  0x52   :  { %v251_v26 = vadd.f32 %v250_v18, %v249_v11  ;;  %v264_v27 = vrot.slane %v263_v19, 2  ;;  %v290_v29 = vrot.slane %v289_v21, 4  ;;  %v271_v33 = vrot.slane %v270_v24, 2 }
  0x53   :  { %v245_v30 = vrot.slane %v244_v22, 1  ;;  %v258_v32 = vadd.f32 %v257_v23, %v256_v15  ;;  %v278_v34 = vrot.slane %v277_v25, 2  ;;  %v284_v37 = vadd.f32 %v283_v28, %v282_v20 }
  0x54   :  { %v252_v35 = vrot.slane %v251_v26, 1  ;;  %v265_v36 = vadd.f32 %v264_v27, %v263_v19  ;;  %v291_v38 = vadd.f32 %v290_v29, %v289_v21  ;;  %v272_v42 = vadd.f32 %v271_v33, %v270_v24 }
  0x55   :  { %v246_v39 = vadd.f32 %v245_v30, %v244_v22  ;;  %v259_v41 = vrot.slane %v258_v32, 1  ;;  %v279_v43 = vadd.f32 %v278_v34, %v277_v25  ;;  %v285_v50 = vrot.slane %v284_v37, 2 }
  0x56   :  { %v638_v45 = vadd.f32 %v252_v35, %v251_v26  ;;  %v266_v47 = vrot.slane %v265_v36, 1  ;;  %v292_v51 = vrot.slane %v291_v38, 2  ;;  %v273_v57 = vrot.slane %v272_v42, 1 }
  0x57   :  { %v640_v56 = vadd.f32 %v259_v41, %v258_v32  ;;  %v280_v58 = vrot.slane %v279_v43, 1  ;;  %v312_v60 = vmul.f32 %v585_v53, %v585_v53  ;;  %v286_v0 = vadd.f32 %v285_v50, %v284_v37 }
  0x58   :  { %v644_v63 = vadd.f32 %v266_v47, %v265_v36  ;;  %v293_v1 = vadd.f32 %v292_v51, %v291_v38  ;;  %v313_v61 = vmul.f32 %v587_v54, %v587_v54  ;;  %v648_v2 = vadd.f32 %v273_v57, %v272_v42 }
  0x59   :  { %v650_v3 = vadd.f32 %v280_v58, %v279_v43  ;;  %v316_v4 = vcombine.high %v312_v60, %v312_v60  ;;  %v323_v5 = vrot.slane %v312_v60, %v576_v31  ;;  %v287_v6 = vrot.slane %v286_v0, 1 }
  0x5a   :  { %v294_v7 = vrot.slane %v293_v1, 1  ;;  %v333_v9 = vcombine.high %v313_v61, %v313_v61  ;;  %v340_v10 = vrot.slane %v313_v61, %v576_v31  ;;  %v658_v54 = vsel %vm414_vm1, %v605_v40, %v246_v39 }
  0x5b   :  { %v330_v53 = vrot.slane %v316_v4, %v576_v31  ;;  %v331_v52 = vcombine.high %v323_v5, %v323_v5  ;;  %v358_v11 = vsel %vm121_vm0, %v323_v5, 0.0  ;;  %v660_v12 = vadd.f32 %v287_v6, %v286_v0 }
  0x5c   :  { %v662_v62 = vadd.f32 %v294_v7, %v293_v1  ;;  %v347_v13 = vrot.slane %v333_v9, %v576_v31  ;;  %v348_v14 = vcombine.high %v340_v10, %v340_v10  ;;  %v359_v16 = vrot.slane %v358_v11, 4 }
  0x5d   :  { %v332_v15 = vcombine.high %v330_v53, %v330_v53  ;;  %v365_v17 = vsel %vm121_vm0, %v331_v52, 0.0  ;;  %v372_v18 = vsel %vm121_vm0, %v330_v53, 0.0  ;;  %v386_v22 = vsel %vm121_vm0, %v340_v10, 0.0 }
  0x5e   :  { %v349_v19 = vcombine.high %v347_v13, %v347_v13  ;;  %v366_v20 = vrot.slane %v365_v17, 4  ;;  %v373_v21 = vrot.slane %v372_v18, 4  ;;  %v360_v40 = vadd.f32 %v359_v16, %v358_v11 }
  0x5f   :  { %v379_v23 = vsel %vm121_vm0, %v332_v15, 0.0  ;;  %v387_v24 = vrot.slane %v386_v22, 4  ;;  %v393_v25 = vsel %vm121_vm0, %v348_v14, 0.0  ;;  %v400_v32 = vsel %vm121_vm0, %v347_v13, 0.0 }
  0x60   :  { %v367_v26 = vadd.f32 %v366_v20, %v365_v17  ;;  %v374_v31 = vadd.f32 %v373_v21, %v372_v18  ;;  %v380_v27 = vrot.slane %v379_v23, 4  ;;  %v394_v28 = vrot.slane %v393_v25, 4 }
  0x61   :  { %v361_v29 = vrot.slane %v360_v40, 2  ;;  %v388_v30 = vadd.f32 %v387_v24, %v386_v22  ;;  %v407_v33 = vsel %vm121_vm0, %v349_v19, 0.0  ;;  %v401_v41 = vrot.slane %v400_v32, 4 }
  0x62   :  { %v368_v34 = vrot.slane %v367_v26, 2  ;;  %v375_v35 = vrot.slane %v374_v31, 2  ;;  %v381_v36 = vadd.f32 %v380_v27, %v379_v23  ;;  %v395_v37 = vadd.f32 %v394_v28, %v393_v25 }
  0x63   :  { %v362_v38 = vadd.f32 %v361_v29, %v360_v40  ;;  %v389_v39 = vrot.slane %v388_v30, 2  ;;  %v408_v42 = vrot.slane %v407_v33, 4  ;;  %v402_v60 = vadd.f32 %v401_v41, %v400_v32 }
  0x64   :  { %v369_v43 = vadd.f32 %v368_v34, %v367_v26  ;;  %v376_v47 = vadd.f32 %v375_v35, %v374_v31  ;;  %v382_v50 = vrot.slane %v381_v36, 2  ;;  %v396_v51 = vrot.slane %v395_v37, 2 }
  0x65   :  { %v363_v57 = vrot.slane %v362_v38, 1  ;;  %v390_v58 = vadd.f32 %v389_v39, %v388_v30  ;;  %v409_v0 = vadd.f32 %v408_v42, %v407_v33  ;;  %v403_v9 = vrot.slane %v402_v60, 2 }
  0x66   :  { %v370_v1 = vrot.slane %v369_v43, 1  ;;  %v377_v61 = vrot.slane %v376_v47, 1  ;;  %v383_v4 = vadd.f32 %v382_v50, %v381_v36  ;;  %v397_v5 = vadd.f32 %v396_v51, %v395_v37 }
  0x67   :  { %v364_v6 = vadd.f32 %v363_v57, %v362_v38  ;;  %v391_v7 = vrot.slane %v390_v58, 1  ;;  %v410_v10 = vrot.slane %v409_v0, 2  ;;  %v404_v15 = vadd.f32 %v403_v9, %v402_v60 }
  0x68   :  { %v371_v53 = vadd.f32 %v370_v1, %v369_v43  ;;  %v378_v52 = vadd.f32 %v377_v61, %v376_v47  ;;  %v384_v11 = vrot.slane %v383_v4, 1  ;;  %v398_v13 = vrot.slane %v397_v5, 1 }
  0x69   :  { %v392_v14 = vadd.f32 %v391_v7, %v390_v58  ;;  %v411_v16 = vadd.f32 %v410_v10, %v409_v0  ;;  %v416_v17 = vsel %vm414_vm1, %v607_v44, %v638_v45  ;;  %v417_v20 = vsel %vm414_vm1, %v611_v48, %v640_v56 }
  0x6a   :  { %v385_v18 = vadd.f32 %v384_v11, %v383_v4  ;;  %v399_v19 = vadd.f32 %v398_v13, %v397_v5  ;;  %v418_v21 = vsel %vm414_vm1, %v616_v55, %v644_v63  ;;  %v405_v22 = vrot.slane %v404_v15, 1 }
  0x6b   :  { %v412_v40 = vrot.slane %v411_v16, 1  ;;  %v419_v23 = vsel %vm414_vm1, %v609_v46, %v648_v2  ;;  %v420_v44 = vsel %vm414_vm1, %v613_v49, %v650_v3  ;;  %v421_v45 = vsel %vm414_vm1, %v622_v59, %v660_v12 }
  0x6c   :  { %v422_v48 = vsel %vm414_vm1, %v632_v8, %v662_v62  ;;  %v423_v55 = vsel %vm121_vm0, %v658_v54, %v364_v6  ;;  %v424_v56 = vsel %vm121_vm0, %v416_v17, %v371_v53  ;;  %v406_v63 = vadd.f32 %v405_v22, %v404_v15 }
  0x6d   :  { %v413_v24 = vadd.f32 %v412_v40, %v411_v16  ;;  %v425_v46 = vsel %vm121_vm0, %v417_v20, %v378_v52  ;;  %v426_v2 = vsel %vm121_vm0, %v418_v21, %v385_v18  ;;  %v427_v49 = vsel %vm121_vm0, %v419_v23, %v392_v14 }
  0x6e   :  { %v428_v3 = vsel %vm121_vm0, %v420_v44, %v399_v19  ;;  %v439_v59 = vcombine.low %v423_v55, %v424_v56  ;;  %v440_v12 = vcombine.low %v425_v46, %v426_v2  ;;  %v429_v25 = vsel %vm121_vm0, %v421_v45, %v406_v63 }
  0x6f   :  { %v430_v8 = vsel %vm121_vm0, %v422_v48, %v413_v24  ;;  %v441_v62 = vcombine.low %v427_v49, %v428_v3 }
  0x70   :  { %v442_v54 = vcombine.low %v429_v25, %v430_v8  ;;  %447 = vst [vmem:[%s719_s5] sm:$0x77] %v439_v59  ;;  %448 = vst [vmem:[%s719_s5 + $0x8] sm:$0x77] %v440_v12 }
  0x71   :  { %449 = vst [vmem:[%s719_s5 + $0x10] sm:$0x77] %v441_v62 }
  0x72   :  { %450 = vst [vmem:[%s719_s5 + $0x18] sm:$0x77] %v442_v54 }
  0x73   :  { %455 = vsyncpa [#allocation4], 1 }
  0x74   :  { %456 = vsyncpa [#allocation6], 1 }

// kernel: uniform_quantizer_forward.3
= control target key start
LH: loop header
LB: loop body
LE: loop exit
PB: predicated region body
PF: predicated region fallthrough
CT: control target
= control target key end

     0   :  { %s106_s0 = inlined_call_operand.<no memory space> [shape: f32[1], index: 0, kind: input, shape index: {}]   ;;  %s107_s1 = inlined_call_operand.<no memory space> [shape: f32[1], index: 1, kind: input, shape index: {}]   ;;  %s108_s4 = inlined_call_operand.vmem [shape: f32[2,1024], index: 4, kind: input, shape index: {}]   ;;  %s109_s2 = inlined_call_operand.<no memory space> [shape: f32[1], index: 2, kind: input, shape index: {}]   ;;  %s110_s3 = inlined_call_operand.<no memory space> [shape: f32[1], index: 3, kind: input, shape index: {}]   ;;  %s111_s5 = inlined_call_operand.vmem [shape: f32[2,1024], index: 5, kind: output, shape index: {}]  }
   0x1   :  { %v24_v0 = vld [vmem:[%s108_s4] sm:$0xff]  ;;  %v27_v1 = vstv %s106_s0  ;;  %v25_v3 = vld [vmem:[%s108_s4 + $0x8] sm:$0xff]  ;;  %v34_v4 = vstv %s107_s1 }
   0x2   :  { %v28_v2 = vmul.f32 %v27_v1, %v24_v0  ;;  %v29_v5 = vmul.f32 %v27_v1, %v25_v3  ;;  %v37_v7 = vstv %s109_s2  ;;  %v41_v10 = vstv %s110_s3 }
   0x4   :  { %v50_v6 = vround.rtne.f32 %v28_v2  ;;  %v51_v8 = vround.rtne.f32 %v29_v5 }
   0x6   :  { %v35_v9 = vmax.f32 %v34_v4, %v50_v6  ;;  %v36_v11 = vmax.f32 %v34_v4, %v51_v8 }
   0x8   :  { %v38_v12 = vmin.f32 %v37_v7, %v35_v9  ;;  %v39_v13 = vmin.f32 %v37_v7, %v36_v11 }
   0xa   :  { %v42_v14 = vmul.f32 %v41_v10, %v38_v12  ;;  %v43_v15 = vmul.f32 %v41_v10, %v39_v13 }
   0xc   :  { %44 = vst [vmem:[%s111_s5] sm:$0xff] %v42_v14  ;;  %45 = vst [vmem:[%s111_s5 + $0x8] sm:$0xff] %v43_v15 }

</bundles_post_ra>
